<compile_context>
chip_gen: v5e
topology: v5e:2x2
jax: 0.10.0
libtpu: 0.0.40
codegen_flags: <defaults>
</compile_context>

<pallas_src>
import functools

import jax
import jax.numpy as jnp
from jax.experimental import pallas as pl
from jax.experimental.pallas import tpu as pltpu


# ---------------------------------------------------------------------------
# Small helpers: padding, tile selection, per-generation VMEM budget.
# ---------------------------------------------------------------------------
def _round_up(x, m):
    return (x + m - 1) // m * m


def _pick_tile(padded_dim, target):
    """Largest multiple-of-128 divisor of `padded_dim` that is <= target (min 128)."""
    t = max(128, min(int(target), int(padded_dim)) // 128 * 128)
    while padded_dim % t:
        t -= 128
    return t


def _fit2(x, rows, cols, dtype):
    """Slice/zero-pad a 2-D array to (rows, cols) and cast."""
    if x.shape[0] > rows:
        x = x[:rows]
    if x.shape[1] > cols:
        x = x[:, :cols]
    pr, pc = rows - x.shape[0], cols - x.shape[1]
    if pr or pc:
        x = jnp.pad(x, ((0, pr), (0, pc)))
    return x.astype(dtype)


@functools.lru_cache(maxsize=1)
def _vmem_limit_bytes():
    # ~3/4 of per-core VMEM (v5e/v6e: 128 MiB -> 96 MiB, v7x: 64 MiB -> 48 MiB).
    try:
        cap = int(pltpu.get_tpu_info().vmem_capacity_bytes)
        return max(32 * 1024 * 1024, min((cap * 3) // 4, 96 * 1024 * 1024))
    except Exception:
        return 48 * 1024 * 1024


# ---------------------------------------------------------------------------
# Kernel 1: tiled matmul  out[M, N] = x[M, K] @ w[K, N]   (neighbor projection)
# ---------------------------------------------------------------------------
def _matmul_kernel(x_ref, w_ref, o_ref, acc_ref):
    @pl.when(pl.program_id(2) == 0)
    def _():
        acc_ref[...] = jnp.zeros_like(acc_ref)

    acc_ref[...] += jnp.dot(x_ref[...], w_ref[...],
                            preferred_element_type=jnp.float32)

    @pl.when(pl.program_id(2) == pl.num_programs(2) - 1)
    def _():
        o_ref[...] = acc_ref[...].astype(o_ref.dtype)


def _tiled_matmul(x, w, out_dtype, tm, tn, tk):
    m, k = x.shape
    _, n = w.shape
    grid = (m // tm, n // tn, k // tk)
    return pl.pallas_call(
        _matmul_kernel,
        out_shape=jax.ShapeDtypeStruct((m, n), out_dtype),
        grid_spec=pltpu.PrefetchScalarGridSpec(
            num_scalar_prefetch=0,
            grid=grid,
            in_specs=[pl.BlockSpec((tm, tk), lambda i, j, kk: (i, kk)),
                      pl.BlockSpec((tk, tn), lambda i, j, kk: (kk, j))],
            out_specs=pl.BlockSpec((tm, tn), lambda i, j, kk: (i, j)),
            scratch_shapes=[pltpu.VMEM((tm, tn), jnp.float32)]),
        compiler_params=pltpu.CompilerParams(
            dimension_semantics=("parallel", "parallel", "arbitrary"),
            vmem_limit_bytes=_vmem_limit_bytes()),
    )(x, w)


# ---------------------------------------------------------------------------
# Kernel 2: fused mean aggregation + self path + bias (+ ReLU)
#   out = (A01 @ P) * inv_deg + h_dst @ W_self + bias
# k tiles the source-node (contraction) dim; everything else happens once per (i, j)
# in the finalize epilogue (h_dst / W_self / bias blocks are k-invariant -> no re-DMA).
# ---------------------------------------------------------------------------
def _sage_agg_kernel(a_ref, p_ref, hd_ref, ws_ref, invd_ref, b_ref, o_ref,
                     acc_ref, *, apply_relu):
    k = pl.program_id(2)

    @pl.when(k == 0)
    def _():
        acc_ref[...] = jnp.zeros_like(acc_ref)

    # A is 0/1 int8 (halves the dominant HBM stream); cast to bf16 for the MXU.
    a_bf16 = a_ref[...].astype(jnp.float32).astype(jnp.bfloat16)
    acc_ref[...] += jnp.dot(a_bf16, p_ref[...],
                            preferred_element_type=jnp.float32)

    @pl.when(k == pl.num_programs(2) - 1)
    def _():
        out = acc_ref[...] * invd_ref[...]                       # exact f32 mean scale
        out += jnp.dot(hd_ref[...], ws_ref[...],                 # fused self path
                       preferred_element_type=jnp.float32)
        out += b_ref[...]
        if apply_relu:
            out = jnp.maximum(out, 0.0)
        o_ref[...] = out.astype(o_ref.dtype)


def _sage_aggregate(adj, p, h_dst, w_self, inv_deg, bias2d, *,
                    apply_relu, out_dtype, tm, tn, tk):
    nd_p, nsrc_p = adj.shape
    fout_p = p.shape[1]
    fin_p = h_dst.shape[1]
    grid = (nd_p // tm, fout_p // tn, nsrc_p // tk)
    kernel = functools.partial(_sage_agg_kernel, apply_relu=apply_relu)
    return pl.pallas_call(
        kernel,
        out_shape=jax.ShapeDtypeStruct((nd_p, fout_p), out_dtype),
        grid_spec=pltpu.PrefetchScalarGridSpec(
            num_scalar_prefetch=0,
            grid=grid,
            in_specs=[
                pl.BlockSpec((tm, tk), lambda i, j, kk: (i, kk)),     # A01 (int8)
                pl.BlockSpec((tk, tn), lambda i, j, kk: (kk, j)),     # P = h_src @ W_n
                pl.BlockSpec((tm, fin_p), lambda i, j, kk: (i, 0)),   # h_dst (self path)
                pl.BlockSpec((fin_p, tn), lambda i, j, kk: (0, j)),   # W_self
                pl.BlockSpec((tm, 1), lambda i, j, kk: (i, 0)),       # 1/deg (f32)
                pl.BlockSpec((1, tn), lambda i, j, kk: (0, j)),       # bias (f32)
            ],
            out_specs=pl.BlockSpec((tm, tn), lambda i, j, kk: (i, j)),
            scratch_shapes=[pltpu.VMEM((tm, tn), jnp.float32)]),
        compiler_params=pltpu.CompilerParams(
            dimension_semantics=("parallel", "parallel", "arbitrary"),
            vmem_limit_bytes=_vmem_limit_bytes()),
    )(adj, p, h_dst, w_self, inv_deg, bias2d)


# ---------------------------------------------------------------------------
# One SAGEConv('mean') layer on padded operands.
# ---------------------------------------------------------------------------
def sage_layer(adj_i8, inv_deg, h_src, w_neigh_p, w_self_p, bias_p, *,
               apply_relu, out_dtype):
    nd_p, nsrc_p = adj_i8.shape
    fin_p = h_src.shape[1]
    fout_p = w_neigh_p.shape[1]

    # Tiles are 128-multiple divisors of the (128-padded) dims.
    tn = fout_p if fout_p <= 512 else _pick_tile(fout_p, 256)  # 1 j tile -> A streamed once
    tm = _pick_tile(nd_p, 512)
    if tm == nd_p and nd_p >= 256:          # v7x: keep >=2 parallel row tiles for 2 TCs
        tm = _pick_tile(nd_p, nd_p // 2)
    tk_s = _pick_tile(nsrc_p, 1024)         # contraction over source nodes
    tk_f = _pick_tile(fin_p, 512)           # contraction over input features
    tm_p = _pick_tile(nsrc_p, 512)          # row tile for the projection

    # 1) Neighbor projection (computed once, reused by every row tile of A), bf16 out.
    p_src = _tiled_matmul(h_src, w_neigh_p, jnp.bfloat16, tm_p, tn, tk_f)
    # 2) Fused mean aggregation + self path + bias (+ ReLU).
    h_dst = h_src[:nd_p]
    return _sage_aggregate(adj_i8, p_src, h_dst, w_self_p, inv_deg, bias_p,
                           apply_relu=apply_relu, out_dtype=out_dtype,
                           tm=tm, tn=tn, tk=tk_s)


# ---------------------------------------------------------------------------
# Block preparation (hoist the pad/cast of the largest array out of the forward).
# Accepts either a 0/1 adjacency or a row-normalized one; degrees are recomputed
# from the sparsity pattern so the 1/deg scaling stays exact f32.
# ---------------------------------------------------------------------------
def prepare_block(a):
    nd, nsrc = a.shape
    adj01 = (a != 0)
    deg = jnp.sum(adj01, axis=1).astype(jnp.float32)
    inv_deg = jnp.where(deg > 0, 1.0 / jnp.maximum(deg, 1.0), 0.0).reshape(nd, 1)
    nd_p, nsrc_p = _round_up(nd, 128), _round_up(nsrc, 128)
    adj_i8 = _fit2(adj01.astype(jnp.int8), nd_p, nsrc_p, jnp.int8)
    inv_deg_p = _fit2(inv_deg, nd_p, 1, jnp.float32)
    return (adj_i8, inv_deg_p, nd, nsrc)


# ---------------------------------------------------------------------------
# SAGE model (parameter setup + forward glue in plain JAX).
# ---------------------------------------------------------------------------
class SAGE:
    def __init__(self, in_feats, h_feats, num_classes, num_layers=2,
                 dropout=0.2, key=None):
        if key is None:
            key = jax.random.PRNGKey(0)
        dims = [in_feats] + [h_feats] * (num_layers - 1) + [num_classes]
        self.params = []        # f32 unpadded (reference / checkpointing)
        self._padded = []       # bf16/f32 padded copies, hoisted out of forward
        for l in range(num_layers):
            f_in, f_out = dims[l], dims[l + 1]
            key, k1, k2 = jax.random.split(key, 3)
            scale = 1.0 / jnp.sqrt(jnp.float32(f_in))
            w_neigh = jax.random.uniform(k1, (f_in, f_out), jnp.float32,
                                         minval=-scale, maxval=scale)
            w_self = jax.random.uniform(k2, (f_in, f_out), jnp.float32,
                                        minval=-scale, maxval=scale)
            bias = jnp.zeros((f_out,), jnp.float32)
            self.params.append((w_neigh, w_self, bias))
            fin_p, fout_p = _round_up(f_in, 128), _round_up(f_out, 128)
            self._padded.append((
                _fit2(w_neigh, fin_p, fout_p, jnp.bfloat16),
                _fit2(w_self, fin_p, fout_p, jnp.bfloat16),
                _fit2(bias.reshape(1, -1), 1, fout_p, jnp.float32),
                fin_p, fout_p))
        self.dropout = dropout  # eval mode: identity
        self.num_classes = num_classes

    def __call__(self, blocks, x):
        n_layers = len(self.params)
        h = x
        num_dst_last = None
        for l, (blk, (w_n_p, w_s_p, b_p, fin_p, fout_p)) in enumerate(
                zip(blocks, self._padded)):
            if not (isinstance(blk, tuple) and len(blk) == 4):
                blk = prepare_block(blk)
            adj_i8, inv_deg_p, num_dst, _ = blk
            nsrc_p = adj_i8.shape[1]
            h = _fit2(h, nsrc_p, fin_p, jnp.bfloat16)
            last = (l == n_layers - 1)
            # TODO(synk): nn.Dropout is identity in eval mode; training-mode stochastic
            # dropout (pltpu PRNG) is not implemented here.
            h = sage_layer(adj_i8, inv_deg_p, h, w_n_p, w_s_p, b_p,
                           apply_relu=not last,
                           out_dtype=jnp.float32 if last else jnp.bfloat16)
            num_dst_last = num_dst
        return h[:num_dst_last, :self.num_classes]


# ---------------------------------------------------------------------------
# Plain-JAX f32 reference for tolerance checks.
# ---------------------------------------------------------------------------
def sage_reference(params, blocks_norm, x):
    h = x
    for l, ((w_n, w_s, b), a_norm) in enumerate(zip(params, blocks_norm)):
        h_dst = h[:a_norm.shape[0]]
        out = a_norm @ (h @ w_n) + h_dst @ w_s + b[None, :]
        if l != len(params) - 1:
            out = jnp.maximum(out, 0.0)
        h = out
    return h


# ---------------------------------------------------------------------------
# Deterministic bipartite block: row-normalized dense adjacency.
# ---------------------------------------------------------------------------
def make_block(key, n_src, n_dst, avg_deg=3.0):
    probs = jax.random.uniform(key, (n_dst, n_src))
    adj = (probs < (avg_deg / n_src)).astype(jnp.float32)
    deg = adj.sum(axis=1, keepdims=True)
    return jnp.where(deg > 0, adj / jnp.maximum(deg, 1.0), 0.0)


def _run_case(key, in_feats, h_feats, num_classes, num_layers, sizes, tol):
    ks = jax.random.split(key, len(sizes) + 2)
    x = jax.random.normal(ks[0], (sizes[0][0], in_feats), jnp.float32)
    blocks_norm = [make_block(ks[i + 2], n_src, n_dst)
                   for i, (n_src, n_dst) in enumerate(sizes)]
    prepared = [prepare_block(a) for a in blocks_norm]   # hoisted pad/cast of A

    model = SAGE(in_feats, h_feats, num_classes, num_layers=num_layers, key=ks[1])
    out = jax.block_until_ready(model(prepared, x))

    assert out.shape == (sizes[-1][1], num_classes), out.shape
    assert bool(jnp.all(jnp.isfinite(out)))

    ref = sage_reference(model.params, blocks_norm, x)
    err = float(jnp.max(jnp.abs(out.astype(jnp.float32) - ref)))
    assert jnp.allclose(out.astype(jnp.float32), ref, atol=tol, rtol=tol), err


if __name__ == "__main__":
    key = jax.random.PRNGKey(0)
    k0, k1 = jax.random.split(key)

    # Case 1: tiny, lane-aligned-ish shapes (16 -> 8 -> 4 nodes, 32/32/16 features).
    _run_case(k0, in_feats=32, h_feats=32, num_classes=16, num_layers=2,
              sizes=[(16, 8), (8, 4)], tol=5e-2)

    # Case 2: padded-boundary shapes (nothing a multiple of 128) with tighter tolerance.
    _run_case(k1, in_feats=96, h_feats=192, num_classes=40, num_layers=2,
              sizes=[(200, 72), (72, 24)], tol=5e-2)

    print("KERNEL_OK")
</pallas_src>

<mosaic_0001>
module attributes {stable_mosaic.version = 11 : i64} {
  func.func @_matmul_kernel(%arg0: i32, %arg1: i32, %arg2: i32, %arg3: memref<128x128xbf16, #tpu.memory_space<vmem>>, %arg4: memref<128x128xbf16, #tpu.memory_space<vmem>>, %arg5: memref<128x128xbf16, #tpu.memory_space<vmem>>, %arg6: memref<128x128xf32, #tpu.memory_space<vmem>>) attributes {dimension_semantics = [#tpu.dimension_semantics<parallel>, #tpu.dimension_semantics<parallel>, #tpu.dimension_semantics<arbitrary>], iteration_bounds = array<i64: 1, 1, 1>, scalar_prefetch = 0 : i64, scratch_operands = 1 : i64, tpu.core_type = #tpu.core_type<tc>, window_params = [{transform_indices = @transform_0, window_bounds = array<i64: 128, 128>}, {transform_indices = @transform_1, window_bounds = array<i64: 128, 128>}, {transform_indices = @transform_2, window_bounds = array<i64: 128, 128>}]} {
    %c0_i32 = arith.constant 0 : i32
    %0 = arith.cmpi eq, %arg2, %c0_i32 : i32
    %1 = arith.extui %0 : i1 to i32
    %c0_i32_0 = arith.constant 0 : i32
    %2 = arith.cmpi ne, %1, %c0_i32_0 : i32
    scf.if %2 {
      %cst_10 = arith.constant 0.000000e+00 : f32
      %12 = vector.broadcast %cst_10 : f32 to vector<128x128xf32>
      %c0_11 = arith.constant 0 : index
      %c0_12 = arith.constant 0 : index
      %13 = vector.load %arg6[%c0_11, %c0_12] : memref<128x128xf32, #tpu.memory_space<vmem>>, vector<128x128xf32>
      tpu.vector_store %arg6[%c0_11, %c0_12], %12 {strides = array<i32>} : memref<128x128xf32, #tpu.memory_space<vmem>>, vector<128x128xf32>,
    } else {
    }
    %c0 = arith.constant 0 : index
    %c0_1 = arith.constant 0 : index
    %3 = vector.load %arg6[%c0, %c0_1] : memref<128x128xf32, #tpu.memory_space<vmem>>, vector<128x128xf32>
    %c0_2 = arith.constant 0 : index
    %c0_3 = arith.constant 0 : index
    %4 = vector.load %arg3[%c0_2, %c0_3] : memref<128x128xbf16, #tpu.memory_space<vmem>>, vector<128x128xbf16>
    %c0_4 = arith.constant 0 : index
    %c0_5 = arith.constant 0 : index
    %5 = vector.load %arg4[%c0_4, %c0_5] : memref<128x128xbf16, #tpu.memory_space<vmem>>, vector<128x128xbf16>
    %cst = arith.constant dense<0.000000e+00> : vector<128x128xf32>
    %6 = tpu.matmul %4, %5, %cst {dimension_numbers = #tpu.dot_dimension_numbers<[1], [0], [0], [1], [0, 0, 1, 1], [], []>} : vector<128x128xbf16>, vector<128x128xbf16>, vector<128x128xf32> -> vector<128x128xf32>
    %7 = arith.addf %3, %6 : vector<128x128xf32>
    %c0_6 = arith.constant 0 : index
    %c0_7 = arith.constant 0 : index
    %8 = vector.load %arg6[%c0_6, %c0_7] : memref<128x128xf32, #tpu.memory_space<vmem>>, vector<128x128xf32>
    tpu.vector_store %arg6[%c0_6, %c0_7], %7 {strides = array<i32>} : memref<128x128xf32, #tpu.memory_space<vmem>>, vector<128x128xf32>,
    %c0_i32_8 = arith.constant 0 : i32
    %9 = arith.cmpi eq, %arg2, %c0_i32_8 : i32
    %10 = arith.extui %9 : i1 to i32
    %c0_i32_9 = arith.constant 0 : i32
    %11 = arith.cmpi ne, %10, %c0_i32_9 : i32
    scf.if %11 {
      %c0_10 = arith.constant 0 : index
      %c0_11 = arith.constant 0 : index
      %12 = vector.load %arg6[%c0_10, %c0_11] : memref<128x128xf32, #tpu.memory_space<vmem>>, vector<128x128xf32>
      %13 = arith.truncf %12 : vector<128x128xf32> to vector<128x128xbf16>
      %c0_12 = arith.constant 0 : index
      %c0_13 = arith.constant 0 : index
      %14 = vector.load %arg5[%c0_12, %c0_13] : memref<128x128xbf16, #tpu.memory_space<vmem>>, vector<128x128xbf16>
      tpu.vector_store %arg5[%c0_12, %c0_13], %13 {strides = array<i32>} : memref<128x128xbf16, #tpu.memory_space<vmem>>, vector<128x128xbf16>,
    } else {
    }
    return
  }
  func.func @transform_0(%arg0: i32, %arg1: i32, %arg2: i32) -> (i32, i32) {
    %c0_i32 = arith.constant 0 : i32
    return %arg0, %arg2 : i32, i32
  }
  func.func @transform_1(%arg0: i32, %arg1: i32, %arg2: i32) -> (i32, i32) {
    %c0_i32 = arith.constant 0 : i32
    return %arg2, %arg1 : i32, i32
  }
  func.func @transform_2(%arg0: i32, %arg1: i32, %arg2: i32) -> (i32, i32) {
    %c0_i32 = arith.constant 0 : i32
    return %arg0, %arg1 : i32, i32
  }
}

</mosaic_0001>

<bundles_post_ra>
// kernel: tpu_custom_call.1
= control target key start
LH: loop header
LB: loop body
LE: loop exit
PB: predicated region body
PF: predicated region fallthrough
CT: control target
= control target key end

     0   :  { %7 = vsyncpa [#allocation4], 0  ;;  %s632_s0 = inlined_call_operand.hbm [shape: bf16[128,128], index: 0, kind: input, shape index: {}]   ;;  %s633_s1 = inlined_call_operand.hbm [shape: bf16[128,128], index: 1, kind: input, shape index: {}]   ;;  %s634_s2 = inlined_call_operand.hbm [shape: bf16[128,128], index: 2, kind: output, shape index: {}]  }
   0x1   :  { %8 = vsyncpa [#allocation7], 0 }
   0x2   :  { %9 = vsyncpa [#allocation5], 0  ;;  %s14_s11 = sshll.u32 %s632_s0, 4  ;;  %s594_s12 = smov [#allocation3]   ;;  %s15_s11 = int_to_ptr.hbm [resolvable:$true] %s14_s11 }
   0x3   :  { %s16_s13 = sshll.u32 %s594_s12, 4  ;;  %s27_s16 = sshll.u32 %s633_s1, 4  ;;  %s17_s13 = int_to_ptr.vmem [resolvable:$true] %s16_s13  ;;  %s28_s16 = int_to_ptr.hbm [resolvable:$true] %s27_s16 }
   0x4   :  { %s595_s17 = smov 64   ;;  %s596_s18 = smov 4  }
   0x5   :  { %22 = dma.hbm_to_vmem [thread:$0]  %s15_s11, 1024, %s17_s13, [#allocation4], %s595_s17, %s595_s17, %s596_s18  }
   0x6   :  { %s597_s19 = smov [#allocation6]  }
   0x7   :  { %s29_s20 = sshll.u32 %s597_s19, 4  ;;  %s30_s20 = int_to_ptr.vmem [resolvable:$true] %s29_s20 }
   0x8   :  { %35 = dma.hbm_to_vmem [thread:$0]  %s28_s16, 1024, %s30_s20, [#allocation7], %s595_s17, %s595_s17, %s596_s18  }
   0x9   :  { %588 = dma.done.wait [#allocation4], 1024  }
   0xa   :  { %589 = vsyncadd [#allocation4], 4294966272 }
   0xb   :  { %590 = dma.done.wait [#allocation7], 1024  }
   0xc   :  { %591 = vsyncadd [#allocation7], 4294966272  ;;  %v439_v0 = vld [vmem:[#allocation6 + $0x38] sm:$0xff]  ;;  %v438_v1 = vld [vmem:[#allocation6 + $0x30] sm:$0xff]  ;;  %s598_s0 = smov [#allocation8]   ;;  %s346_s23 = sshll.u32 %s634_s2, 4  ;;  %s347_s23 = int_to_ptr.hbm [resolvable:$true] %s346_s23 }
   0xd   :  { %208 = vmatpush.bf16.msra.mxu0 %v439_v0  ;;  %487 = vmatpush.bf16.msra.mxu1 %v439_v0  ;;  %v437_v2 = vld [vmem:[#allocation6 + $0x28] sm:$0xff]  ;;  %v436_v3 = vld [vmem:[#allocation6 + $0x20] sm:$0xff]  ;;  %v435_v4 = vld [vmem:[#allocation6 + $0x18] sm:$0xff]  ;;  %s344_s1 = sshll.u32 %s598_s0, 4  ;;  %s345_s1 = int_to_ptr.vmem [resolvable:$true] %s344_s1 }
   0xe   :  { %488 = vmatpush.bf16.msra.mxu2 %v439_v0  ;;  %489 = vmatpush.bf16.msra.mxu3 %v439_v0  ;;  %v434_v5 = vld [vmem:[#allocation6 + $0x10] sm:$0xff]  ;;  %v433_v6 = vld [vmem:[#allocation6 + $0x8] sm:$0xff]  ;;  %v432_v7 = vld [vmem:[#allocation6] sm:$0xff] }
   0xf   :  { %v424_v8 = vld [vmem:[#allocation3] sm:$0xff]  ;;  %v426_v9 = vld [vmem:[#allocation3 + $0x10] sm:$0xff]  ;;  %v425_v12 = vld [vmem:[#allocation3 + $0x8] sm:$0xff] }
  0x10   :  { %v428_v10 = vld [vmem:[#allocation3 + $0x20] sm:$0xff]  ;;  %v430_v11 = vld [vmem:[#allocation3 + $0x30] sm:$0xff]  ;;  %v427_v13 = vld [vmem:[#allocation3 + $0x18] sm:$0xff] }
  0x11   :  { %209 = vmatpush.bf16.msra.mxu0 %v438_v1  ;;  %490 = vmatpush.bf16.msra.mxu1 %v438_v1  ;;  %v429_v14 = vld [vmem:[#allocation3 + $0x28] sm:$0xff]  ;;  %v431_v15 = vld [vmem:[#allocation3 + $0x38] sm:$0xff] }
  0x12   :  { %491 = vmatpush.bf16.msra.mxu2 %v438_v1  ;;  %492 = vmatpush.bf16.msra.mxu3 %v438_v1 }
  0x15   :  { %210 = vmatpush.bf16.msra.mxu0 %v437_v2  ;;  %493 = vmatpush.bf16.msra.mxu1 %v437_v2 }
  0x16   :  { %494 = vmatpush.bf16.msra.mxu2 %v437_v2  ;;  %495 = vmatpush.bf16.msra.mxu3 %v437_v2 }
  0x19   :  { %211 = vmatpush.bf16.msra.mxu0 %v436_v3  ;;  %496 = vmatpush.bf16.msra.mxu1 %v436_v3 }
  0x1a   :  { %497 = vmatpush.bf16.msra.mxu2 %v436_v3  ;;  %498 = vmatpush.bf16.msra.mxu3 %v436_v3 }
  0x1d   :  { %212 = vmatpush.bf16.msra.mxu0 %v435_v4  ;;  %499 = vmatpush.bf16.msra.mxu1 %v435_v4 }
  0x1e   :  { %500 = vmatpush.bf16.msra.mxu2 %v435_v4  ;;  %501 = vmatpush.bf16.msra.mxu3 %v435_v4 }
  0x21   :  { %213 = vmatpush.bf16.msra.mxu0 %v434_v5  ;;  %502 = vmatpush.bf16.msra.mxu1 %v434_v5 }
  0x22   :  { %503 = vmatpush.bf16.msra.mxu2 %v434_v5  ;;  %504 = vmatpush.bf16.msra.mxu3 %v434_v5 }
  0x25   :  { %214 = vmatpush.bf16.msra.mxu0 %v433_v6  ;;  %505 = vmatpush.bf16.msra.mxu1 %v433_v6 }
  0x26   :  { %506 = vmatpush.bf16.msra.mxu2 %v433_v6  ;;  %507 = vmatpush.bf16.msra.mxu3 %v433_v6 }
  0x29   :  { %215 = vmatpush.bf16.msra.mxu0 %v432_v7  ;;  %508 = vmatpush.bf16.msra.mxu1 %v432_v7 }
  0x2a   :  { %509 = vmatpush.bf16.msra.mxu2 %v432_v7  ;;  %510 = vmatpush.bf16.msra.mxu3 %v432_v7 }
  0x2c   :  { %216 = vmatmul.bf16.vlgmr.msra.gmra.mxu0 %v424_v8  ;;  %226 = vmatmul.bf16.vlgmr.msra.gmra.mxu1 %v426_v9 }
  0x2d   :  { %236 = vmatmul.bf16.vlgmr.msra.gmra.mxu2 %v428_v10  ;;  %246 = vmatmul.bf16.vlgmr.msra.gmra.mxu3 %v430_v11 }
  0x3c   :  { %221 = vmatmul.bf16.gmra.mxu0 %v425_v12  ;;  %231 = vmatmul.bf16.gmra.mxu1 %v427_v13 }
  0x3d   :  { %241 = vmatmul.bf16.gmra.mxu2 %v429_v14  ;;  %251 = vmatmul.bf16.gmra.mxu3 %v431_v15 }
  0xa9   :  { %v217_v16 = vpop.f32.mrf.mxu0  ;;  %v227_v17 = vpop.f32.mrf.mxu1 }
  0xb0   :  { %v237_v18 = vpop.f32.mrf.mxu2  ;;  %v247_v19 = vpop.f32.mrf.mxu3 }
  0xb1   :  { %v219_v20 = vpop.f32.mrf.mxu0  ;;  %v229_v21 = vpop.f32.mrf.mxu1 }
  0xb2   :  { %v443_v22 = vpack.c.bf16 %v219_v20, %v217_v16  ;;  %v453_v23 = vpack.c.bf16 %v229_v21, %v227_v17 }
  0xb4   :  { %444 = vst [vmem:[#allocation8] sm:$0xff] %v443_v22  }
  0xb5   :  { %481 = vst [vmem:[#allocation8 + $0x10] sm:$0xff] %v453_v23  }
  0xb8   :  { %v239_v24 = vpop.f32.mrf.mxu2  ;;  %v249_v25 = vpop.f32.mrf.mxu3 }
  0xb9   :  { %v463_v26 = vpack.c.bf16 %v239_v24, %v237_v18  ;;  %v473_v27 = vpack.c.bf16 %v249_v25, %v247_v19  ;;  %v222_v28 = vpop.f32.mrf.mxu0  ;;  %v232_v29 = vpop.f32.mrf.mxu1 }
  0xbb   :  { %483 = vst [vmem:[#allocation8 + $0x20] sm:$0xff] %v463_v26  }
  0xbc   :  { %485 = vst [vmem:[#allocation8 + $0x30] sm:$0xff] %v473_v27  }
  0xc0   :  { %v242_v30 = vpop.f32.mrf.mxu2  ;;  %v252_v31 = vpop.f32.mrf.mxu3 }
  0xc1   :  { %v224_v32 = vpop.f32.mrf.mxu0  ;;  %v234_v33 = vpop.f32.mrf.mxu1 }
  0xc2   :  { %v448_v34 = vpack.c.bf16 %v224_v32, %v222_v28  ;;  %v458_v35 = vpack.c.bf16 %v234_v33, %v232_v29 }
  0xc4   :  { %480 = vst [vmem:[#allocation8 + $0x8] sm:$0xff] %v448_v34  }
  0xc5   :  { %482 = vst [vmem:[#allocation8 + $0x18] sm:$0xff] %v458_v35  }
  0xc8   :  { %v244_v36 = vpop.f32.mrf.mxu2  ;;  %v254_v37 = vpop.f32.mrf.mxu3 }
  0xc9   :  { %v468_v38 = vpack.c.bf16 %v244_v36, %v242_v30  ;;  %v478_v39 = vpack.c.bf16 %v254_v37, %v252_v31 }
  0xcb   :  { %484 = vst [vmem:[#allocation8 + $0x28] sm:$0xff] %v468_v38  }
  0xcc   :  { %486 = vst [vmem:[#allocation8 + $0x38] sm:$0xff] %v478_v39  }
  0xcd   :  { %352 = dma.vmem_to_hbm [thread:$0]  %s345_s1, 1024, %s347_s23, [#allocation5], %s595_s17, %s595_s17, %s596_s18  }
  0xce   :  { %592 = dma.done.wait [#allocation5], 1024  }
  0xcf   :  { %593 = vsyncadd [#allocation5], 4294966272 }
  0xd0   :  { %357 = vsyncpa [#allocation4], 1 }
  0xd1   :  { %358 = vsyncpa [#allocation7], 1 }
  0xd2   :  { %359 = vsyncpa [#allocation5], 1 }

</bundles_post_ra>
